<compile_context>
chip_gen: v6e
topology: v6e:2x2x1
jax: 0.10.0
libtpu: 0.0.40
codegen_flags: <defaults>
</compile_context>

<pallas_src>
import functools

import jax
import jax.numpy as jnp
from jax.experimental import pallas as pl
from jax.experimental.pallas import tpu as pltpu

_MIB = 1 << 20
_BUFFER_BUDGET = 40 * _MIB   # cap for 2x(in+out) double-buffered tile bytes (safe on v5e/v6e/v7x)
_STEP_TARGET = 1 * _MIB      # move >= ~1 MiB per grid step to amortize ~0.35us step overhead


# ---------------------------------------------------------------------------
# Fused path: squeeze + excite + scale in a single pass over x.
# ---------------------------------------------------------------------------
def _se_fused_kernel(x_ref, w1t_ref, w2t_ref, o_ref):
    # x_ref: (bt, HW, C)   w1t_ref: (C, mid)   w2t_ref: (mid, C)   o_ref: (bt, HW, C)
    x = x_ref[...]
    inv_hw = 1.0 / x.shape[1]

    # Squeeze: mean over the spatial (sublane) axis, accumulated in f32.
    pooled = jnp.sum(x.astype(jnp.float32), axis=1) * inv_hw            # (bt, C)

    # Excite: lane-dense row matmuls (FLOPs are negligible: 2*C*mid).
    h = jnp.dot(pooled, w1t_ref[...].astype(jnp.float32),
                preferred_element_type=jnp.float32)                     # (bt, mid)
    h = jnp.maximum(h, 0.0)
    s = jax.nn.sigmoid(jnp.dot(h, w2t_ref[...].astype(jnp.float32),
                               preferred_element_type=jnp.float32))     # (bt, C)

    # Scale: gate in the input dtype, broadcast the (bt, 1, C) row down sublanes.
    o_ref[...] = x * s[:, None, :].astype(x.dtype)


def _se_fused(x_nhwc, w1t, w2t, *, bt):
    b, hw, c = x_nhwc.shape
    mid = w1t.shape[1]
    itemsize = jnp.dtype(x_nhwc.dtype).itemsize
    tile_bytes = bt * hw * c * itemsize

    return pl.pallas_call(
        _se_fused_kernel,
        out_shape=jax.ShapeDtypeStruct((b, hw, c), x_nhwc.dtype),
        grid_spec=pltpu.PrefetchScalarGridSpec(
            num_scalar_prefetch=0,
            grid=(b // bt,),
            in_specs=[
                pl.BlockSpec((bt, hw, c), lambda i: (i, 0, 0)),
                pl.BlockSpec((c, mid), lambda i: (0, 0)),
                pl.BlockSpec((mid, c), lambda i: (0, 0)),
            ],
            out_specs=pl.BlockSpec((bt, hw, c), lambda i: (i, 0, 0)),
        ),
        compiler_params=pltpu.CompilerParams(
            dimension_semantics=("parallel",),
            vmem_limit_bytes=_vmem_limit(tile_bytes, c, mid),
        ),
        # The NHWC slab is a wrapper-internal temporary; overwrite it in place.
        input_output_aliases={0: 0},
    )(x_nhwc, w1t, w2t)


# ---------------------------------------------------------------------------
# Two-pass path: spatially tiled pool+excite kernel, then a pure scale kernel.
# Used only when a full (HW, C) image tile would not fit the VMEM budget.
# ---------------------------------------------------------------------------
def _se_pool_excite_kernel(x_ref, w1t_ref, w2t_ref, g_ref, acc_ref, *, inv_hw):
    # x_ref: (1, THW, C)   g_ref: (1, 1, C) f32   acc_ref: (1, C) f32 scratch
    j = pl.program_id(1)

    @pl.when(j == 0)
    def _():
        acc_ref[...] = jnp.zeros_like(acc_ref)

    # Partial spatial sum for this tile (sublane reduction, f32 accumulation).
    acc_ref[...] += jnp.sum(x_ref[0].astype(jnp.float32), axis=0, keepdims=True)

    @pl.when(j == pl.num_programs(1) - 1)
    def _():
        pooled = acc_ref[...] * inv_hw                                   # (1, C)
        h = jnp.maximum(
            jnp.dot(pooled, w1t_ref[...].astype(jnp.float32),
                    preferred_element_type=jnp.float32), 0.0)            # (1, mid)
        s = jax.nn.sigmoid(jnp.dot(h, w2t_ref[...].astype(jnp.float32),
                                   preferred_element_type=jnp.float32))  # (1, C)
        g_ref[...] = s[None]                                             # (1, 1, C)


def _se_scale_kernel(x_ref, g_ref, o_ref):
    # x_ref/o_ref: (1, THW, C)   g_ref: (1, 1, C)
    x = x_ref[...]
    o_ref[...] = x * g_ref[...].astype(x.dtype)


def _se_two_pass(x_nhwc, w1t, w2t, *, buffer_budget_bytes):
    b, hw, c = x_nhwc.shape
    mid = w1t.shape[1]
    itemsize = jnp.dtype(x_nhwc.dtype).itemsize

    thw = _choose_spatial_tile(hw, c, itemsize, buffer_budget_bytes)
    n_hw = hw // thw
    vmem_limit = _vmem_limit(thw * c * itemsize, c, mid)

    # Pass 1: accumulate the spatial mean per image, then excite -> gates.
    gates = pl.pallas_call(
        functools.partial(_se_pool_excite_kernel, inv_hw=1.0 / hw),
        out_shape=jax.ShapeDtypeStruct((b, 1, c), jnp.float32),
        grid_spec=pltpu.PrefetchScalarGridSpec(
            num_scalar_prefetch=0,
            grid=(b, n_hw),                      # reduction (spatial) axis last
            in_specs=[
                pl.BlockSpec((1, thw, c), lambda i, j: (i, j, 0)),
                pl.BlockSpec((c, mid), lambda i, j: (0, 0)),
                pl.BlockSpec((mid, c), lambda i, j: (0, 0)),
            ],
            out_specs=pl.BlockSpec((1, 1, c), lambda i, j: (i, 0, 0)),
            scratch_shapes=[pltpu.VMEM((1, c), jnp.float32)],
        ),
        compiler_params=pltpu.CompilerParams(
            dimension_semantics=("parallel", "arbitrary"),
            vmem_limit_bytes=vmem_limit,
        ),
    )(x_nhwc, w1t, w2t)

    # Pass 2: lane-dense channel rescale, streaming x once more.
    return pl.pallas_call(
        _se_scale_kernel,
        out_shape=jax.ShapeDtypeStruct((b, hw, c), x_nhwc.dtype),
        grid_spec=pltpu.PrefetchScalarGridSpec(
            num_scalar_prefetch=0,
            grid=(b, n_hw),
            in_specs=[
                pl.BlockSpec((1, thw, c), lambda i, j: (i, j, 0)),
                pl.BlockSpec((1, 1, c), lambda i, j: (i, 0, 0)),
            ],
            out_specs=pl.BlockSpec((1, thw, c), lambda i, j: (i, j, 0)),
        ),
        compiler_params=pltpu.CompilerParams(
            dimension_semantics=("parallel", "parallel"),
            vmem_limit_bytes=vmem_limit,
        ),
        input_output_aliases={0: 0},
    )(x_nhwc, gates)


# ---------------------------------------------------------------------------
# Trace-time tiling / VMEM helpers.
# ---------------------------------------------------------------------------
def _vmem_limit(tile_bytes, c, mid):
    # 2x double-buffered (in + out) activation tiles + weight blocks + headroom.
    need = 4 * tile_bytes + 8 * c * mid * 4 + 2 * _MIB
    return int(min(max(need, 32 * _MIB), 56 * _MIB))


def _choose_batch_tile(b, per_image_bytes, budget_bytes, step_target_bytes):
    """Largest divisor `bt` of `b` whose 2x(in+out) buffering fits the budget,
    stopping once a grid step moves >= step_target bytes; capped at b//2 so a
    multi-image batch still yields >= 2 grid steps for v7x's two TensorCores.
    Returns 0 if even bt=1 does not fit (caller falls back to spatial tiling)."""
    if 4 * per_image_bytes > budget_bytes:
        return 0
    bt_cap = max(1, b // 2) if b >= 2 else 1
    best = 1
    for bt in range(1, bt_cap + 1):
        if b % bt:
            continue
        if 4 * bt * per_image_bytes > budget_bytes:
            break
        best = bt
        if bt * per_image_bytes >= step_target_bytes:
            break
    return best


def _choose_spatial_tile(hw, c, itemsize, budget_bytes):
    """Largest sublane-aligned (multiple-of-8) divisor of hw whose 2x(in+out)
    buffering fits the budget."""
    best = 0
    for thw in range(8, hw + 1, 8):
        if hw % thw:
            continue
        if 4 * thw * c * itemsize > budget_bytes:
            break
        best = thw
    if best:
        return best
    for thw in range(8, hw + 1, 8):      # nothing fits: smallest aligned divisor
        if hw % thw == 0:
            return thw
    return hw                            # no sublane-aligned divisor: full extent


# ---------------------------------------------------------------------------
# Public wrapper (PyTorch-compatible NCHW interface) + pure-JAX reference.
# ---------------------------------------------------------------------------
def se_block(x, w1, w2, *, buffer_budget_bytes=_BUFFER_BUDGET):
    """SEBlock forward.  x: (B, C, H, W); w1: (mid, C); w2: (C, mid)."""
    b, c, h, w = x.shape
    hw = h * w
    itemsize = jnp.dtype(x.dtype).itemsize

    # NHWC-style slab: channels on the lane axis, spatial on sublanes.
    # (In a real NHWC model this transpose is free layout plumbing.)
    x_nhwc = jnp.transpose(x, (0, 2, 3, 1)).reshape(b, hw, c)
    w1t = w1.T        # (C, mid)
    w2t = w2.T        # (mid, C)

    bt = _choose_batch_tile(b, hw * c * itemsize, buffer_budget_bytes, _STEP_TARGET)
    if bt > 0:
        out_nhwc = _se_fused(x_nhwc, w1t, w2t, bt=bt)
    else:
        out_nhwc = _se_two_pass(x_nhwc, w1t, w2t,
                                buffer_budget_bytes=buffer_budget_bytes)

    return out_nhwc.reshape(b, h, w, c).transpose(0, 3, 1, 2)


def se_block_reference(x, w1, w2):
    """Pure-JAX reference mirroring the PyTorch forward."""
    b, c, _, _ = x.shape
    y = jnp.mean(x, axis=(2, 3))                  # AdaptiveAvgPool2d(1) -> (B, C)
    y = jnp.maximum(y @ w1.T, 0.0)                # Linear(C->mid, no bias) + ReLU
    y = jax.nn.sigmoid(y @ w2.T)                  # Linear(mid->C, no bias) + Sigmoid
    return x * y.reshape(b, c, 1, 1)


if __name__ == "__main__":
    key = jax.random.PRNGKey(0)
    B, C, H, W = 2, 4, 16, 16
    r = 16
    mid = C // r if C > r else 1                  # matches SEBlock.__init__

    k_x, k_w1, k_w2 = jax.random.split(key, 3)
    x = jax.random.normal(k_x, (B, C, H, W), dtype=jnp.float32)
    # Deterministic synthetic weights (PyTorch Linear weight shape = (out, in)).
    w1 = jax.random.normal(k_w1, (mid, C), dtype=jnp.float32) * 0.5
    w2 = jax.random.normal(k_w2, (C, mid), dtype=jnp.float32) * 0.5

    ref = se_block_reference(x, w1, w2)

    # Fused single-pass path (default VMEM budget).
    out = jax.jit(se_block)(x, w1, w2)
    jax.block_until_ready(out)
    assert out.shape == (B, C, H, W)
    assert jnp.allclose(out, ref, atol=1e-5, rtol=1e-5), "fused path mismatch"

    # Force the VMEM-constrained two-pass (spatially tiled) path on the same
    # small shapes by shrinking the trace-time buffer budget.
    out2 = jax.jit(functools.partial(se_block, buffer_budget_bytes=1))(x, w1, w2)
    jax.block_until_ready(out2)
    assert jnp.allclose(out2, ref, atol=1e-5, rtol=1e-5), "two-pass path mismatch"

    print("KERNEL_OK")
</pallas_src>

<mosaic_0001>
module attributes {stable_mosaic.version = 11 : i64} {
  func.func @_se_fused_kernel(%arg0: i32, %arg1: memref<1x256x4xf32, #tpu.memory_space<vmem>>, %arg2: memref<4x1xf32, #tpu.memory_space<vmem>>, %arg3: memref<1x4xf32, #tpu.memory_space<vmem>>, %arg4: memref<1x256x4xf32, #tpu.memory_space<vmem>>) attributes {dimension_semantics = [#tpu.dimension_semantics<parallel>], iteration_bounds = array<i64: 2>, scalar_prefetch = 0 : i64, scratch_operands = 0 : i64, tpu.core_type = #tpu.core_type<tc>, window_params = [{transform_indices = @transform_0, window_bounds = array<i64: 1, 256, 4>}, {pipeline_mode = #tpu.pipeline_mode<synchronous>, transform_indices = @transform_1, window_bounds = array<i64: 4, 1>}, {pipeline_mode = #tpu.pipeline_mode<synchronous>, transform_indices = @transform_2, window_bounds = array<i64: 1, 4>}, {transform_indices = @transform_3, window_bounds = array<i64: 1, 256, 4>}]} {
    %c0 = arith.constant 0 : index
    %c0_0 = arith.constant 0 : index
    %c0_1 = arith.constant 0 : index
    %0 = vector.load %arg1[%c0, %c0_0, %c0_1] : memref<1x256x4xf32, #tpu.memory_space<vmem>>, vector<1x256x4xf32>
    %cst = arith.constant dense<0.000000e+00> : vector<1x4xf32>
    %1 = vector.multi_reduction <add>, %0, %cst [1] : vector<1x256x4xf32> to vector<1x4xf32>
    %cst_2 = arith.constant 3.906250e-03 : f32
    %2 = vector.broadcast %cst_2 : f32 to vector<1x4xf32>
    %3 = arith.mulf %1, %2 : vector<1x4xf32>
    %c0_3 = arith.constant 0 : index
    %c0_4 = arith.constant 0 : index
    %4 = vector.load %arg2[%c0_3, %c0_4] : memref<4x1xf32, #tpu.memory_space<vmem>>, vector<4x1xf32>
    %cst_5 = arith.constant dense<0.000000e+00> : vector<1x1xf32>
    %5 = tpu.matmul %3, %4, %cst_5 {dimension_numbers = #tpu.dot_dimension_numbers<[1], [0], [0], [1], [0, 0, 1, 1], [], []>} : vector<1x4xf32>, vector<4x1xf32>, vector<1x1xf32> -> vector<1x1xf32>
    %cst_6 = arith.constant 0.000000e+00 : f32
    %6 = vector.broadcast %cst_6 : f32 to vector<1x1xf32>
    %7 = arith.maximumf %5, %6 : vector<1x1xf32>
    %c0_7 = arith.constant 0 : index
    %c0_8 = arith.constant 0 : index
    %8 = vector.load %arg3[%c0_7, %c0_8] : memref<1x4xf32, #tpu.memory_space<vmem>>, vector<1x4xf32>
    %cst_9 = arith.constant dense<0.000000e+00> : vector<1x4xf32>
    %9 = tpu.matmul %7, %8, %cst_9 {dimension_numbers = #tpu.dot_dimension_numbers<[1], [0], [0], [1], [0, 0, 1, 1], [], []>} : vector<1x1xf32>, vector<1x4xf32>, vector<1x4xf32> -> vector<1x4xf32>
    %10 = arith.negf %9 : vector<1x4xf32>
    %11 = math.exp %10 : vector<1x4xf32>
    %cst_10 = arith.constant 1.000000e+00 : f32
    %12 = vector.broadcast %cst_10 : f32 to vector<1x4xf32>
    %13 = arith.addf %12, %11 : vector<1x4xf32>
    %14 = arith.divf %12, %13 : vector<1x4xf32>
    %15 = vector.shape_cast %14 : vector<1x4xf32> to vector<1x1x4xf32>
    %16 = vector.broadcast %15 : vector<1x1x4xf32> to vector<1x256x4xf32>
    %17 = arith.mulf %0, %16 : vector<1x256x4xf32>
    %c0_11 = arith.constant 0 : index
    %c0_12 = arith.constant 0 : index
    %c0_13 = arith.constant 0 : index
    %18 = vector.load %arg4[%c0_11, %c0_12, %c0_13] : memref<1x256x4xf32, #tpu.memory_space<vmem>>, vector<1x256x4xf32>
    tpu.vector_store %arg4[%c0_11, %c0_12, %c0_13], %17 {strides = array<i32>} : memref<1x256x4xf32, #tpu.memory_space<vmem>>, vector<1x256x4xf32>,
    return
  }
  func.func @transform_0(%arg0: i32) -> (i32, i32, i32) {
    %c0_i32 = arith.constant 0 : i32
    %c0_i32_0 = arith.constant 0 : i32
    %c0_i32_1 = arith.constant 0 : i32
    return %arg0, %c0_i32, %c0_i32_0 : i32, i32, i32
  }
  func.func @transform_1(%arg0: i32) -> (i32, i32) {
    %c0_i32 = arith.constant 0 : i32
    %c0_i32_0 = arith.constant 0 : i32
    %c0_i32_1 = arith.constant 0 : i32
    return %c0_i32, %c0_i32_0 : i32, i32
  }
  func.func @transform_2(%arg0: i32) -> (i32, i32) {
    %c0_i32 = arith.constant 0 : i32
    %c0_i32_0 = arith.constant 0 : i32
    %c0_i32_1 = arith.constant 0 : i32
    return %c0_i32, %c0_i32_0 : i32, i32
  }
  func.func @transform_3(%arg0: i32) -> (i32, i32, i32) {
    %c0_i32 = arith.constant 0 : i32
    %c0_i32_0 = arith.constant 0 : i32
    %c0_i32_1 = arith.constant 0 : i32
    return %arg0, %c0_i32, %c0_i32_0 : i32, i32, i32
  }
}

</mosaic_0001>

<bundles_post_ra>
// kernel: se_block.1
= control target key start
LH: loop header
LB: loop body
LE: loop exit
PB: predicated region body
PF: predicated region fallthrough
CT: control target
= control target key end

     0   :  { %s637_s12 = smov 0   ;;  %s928_s0 = inlined_call_operand.vmem [shape: f32[2,256,4], index: 0, kind: input, shape index: {}, may-alias: {0,3}]   ;;  %s929_s1 = inlined_call_operand.vmem [shape: f32[4,1], index: 1, kind: input, shape index: {}]   ;;  %s930_s2 = inlined_call_operand.vmem [shape: f32[1,4], index: 2, kind: input, shape index: {}]   ;;  %s931_s3 = inlined_call_operand.vmem [shape: f32[2,256,4], index: 3, kind: output, shape index: {}, may-alias: {0,3}]  }
   0x1 LB: > { %s561_s13 = sadd.s32 4294967295, %s613_s12   ;;  %p565_p0 = scmp.ge.s32.totalorder %s613_s12, 1  ;;  %s613_s12 = sphi %s637_s12, %s13_s12  }
   0x2   : > { %p137_p1 = scmp.lt.s32.totalorder %s613_s12, 3 }
   0x4   : > { %p138_p2 = pnand %p565_p0, %p137_p1 }
   0x5   : > { %p161_p3 = scmp.lt.s32.totalorder (!%p138_p2), %s561_s13, 1 }
   0x6   : > { %141 = sbr.rel (%p138_p2) target bundleno = 533 (0x215), region = 32 }
   0xb   : > { %v274_v0 = vld [vmem:[%s929_s1] sm:$0xf]  ;;  %vm278_vm0 = vcmask 1043456   ;;  %v615_v1 = vmov 0.0   ;;  %vm616_vm1 = vmmov 0   ;;  %s933_s13 = smov (!%p161_p3, %s561_s13), 1 }
   0xc   : > { %583 = vmatprep.subr.mxu0 %v615_v1  ;;  %585 = vmatprep.mubr.msk.f32.mxu0 %vm616_vm1, %v615_v1  ;;  %s577_s16 = sshll.u32 %s933_s13, 8  ;;  %vm203_vm2 = vcmask 31744   ;;  %vm358_vm3 = vcmask 1040384   ;;  %vm354_vm4 = vcmask 7168  }
   0xd   : > { %584 = vmatpush3.msk.msra.mxu0 %vm278_vm0, %v274_v0  ;;  %588 = vmatprep.subr.mxu1 %v615_v1  ;;  %s656_s19 = scalar_lea.vmem %s928_s0, %s577_s16  ;;  %s827_s24 = scalar_lea.vmem %s931_s3, %s577_s16 }
   0xe   : > { %590 = vmatprep.mubr.msk.f32.mxu1 %vm616_vm1, %v615_v1  ;;  %v659_v2 = vld [vmem:[%s656_s19] sm:$0xff]  ;;  %v662_v3 = vld [vmem:[%s656_s19 + $0x8] sm:$0xff]  ;;  %v665_v4 = vld [vmem:[%s656_s19 + $0x10] sm:$0xff] }
   0xf   : > { %v668_v5 = vld [vmem:[%s656_s19 + $0x18] sm:$0xff]  ;;  %v204_v6 = vsel %vm203_vm2, %v659_v2, 0.0  ;;  %v205_v7 = vsel %vm203_vm2, %v662_v3, 0.0  ;;  %v207_v8 = vsel %vm203_vm2, %v665_v4, 0.0  ;;  %v677_v9 = vld [vmem:[%s656_s19 + $0x20] sm:$0xff]  ;;  %v682_v12 = vld [vmem:[%s656_s19 + $0x28] sm:$0xff] }
  0x10   : > { %v206_v10 = vadd.f32 %v205_v7, %v204_v6  ;;  %v209_v11 = vsel %vm203_vm2, %v668_v5, 0.0  ;;  %v211_v14 = vsel %vm203_vm2, %v677_v9, 0.0  ;;  %v687_v15 = vld [vmem:[%s656_s19 + $0x30] sm:$0xff]  ;;  %v213_v17 = vsel %vm203_vm2, %v682_v12, 0.0  ;;  %v692_v18 = vld [vmem:[%s656_s19 + $0x38] sm:$0xff]  ;;  %v697_v21 = vld [vmem:[%s656_s19 + $0x40] sm:$0xff] }
  0x11   : > { %v215_v20 = vsel %vm203_vm2, %v687_v15, 0.0  ;;  %v217_v23 = vsel %vm203_vm2, %v692_v18, 0.0  ;;  %v702_v24 = vld [vmem:[%s656_s19 + $0x48] sm:$0xff]  ;;  %v219_v26 = vsel %vm203_vm2, %v697_v21, 0.0  ;;  %v707_v27 = vld [vmem:[%s656_s19 + $0x50] sm:$0xff]  ;;  %v712_v30 = vld [vmem:[%s656_s19 + $0x58] sm:$0xff] }
  0x12   : > { %v208_v13 = vadd.f32 %v207_v8, %v206_v10  ;;  %v221_v29 = vsel %vm203_vm2, %v702_v24, 0.0  ;;  %v223_v32 = vsel %vm203_vm2, %v707_v27, 0.0  ;;  %v717_v33 = vld [vmem:[%s656_s19 + $0x60] sm:$0xff]  ;;  %v225_v35 = vsel %vm203_vm2, %v712_v30, 0.0  ;;  %v722_v36 = vld [vmem:[%s656_s19 + $0x68] sm:$0xff]  ;;  %v727_v39 = vld [vmem:[%s656_s19 + $0x70] sm:$0xff] }
  0x13   : > { %v227_v38 = vsel %vm203_vm2, %v717_v33, 0.0  ;;  %v229_v41 = vsel %vm203_vm2, %v722_v36, 0.0  ;;  %v732_v42 = vld [vmem:[%s656_s19 + $0x78] sm:$0xff]  ;;  %v231_v44 = vsel %vm203_vm2, %v727_v39, 0.0  ;;  %v737_v45 = vld [vmem:[%s656_s19 + $0x80] sm:$0xff]  ;;  %v742_v48 = vld [vmem:[%s656_s19 + $0x88] sm:$0xff] }
  0x14   : > { %v210_v16 = vadd.f32 %v209_v11, %v208_v13  ;;  %v233_v47 = vsel %vm203_vm2, %v732_v42, 0.0  ;;  %v235_v50 = vsel %vm203_vm2, %v737_v45, 0.0  ;;  %v747_v51 = vld [vmem:[%s656_s19 + $0x90] sm:$0xff]  ;;  %v237_v53 = vsel %vm203_vm2, %v742_v48, 0.0  ;;  %v752_v54 = vld [vmem:[%s656_s19 + $0x98] sm:$0xff]  ;;  %v757_v57 = vld [vmem:[%s656_s19 + $0xa0] sm:$0xff] }
  0x15   : > { %v239_v56 = vsel %vm203_vm2, %v747_v51, 0.0  ;;  %v241_v59 = vsel %vm203_vm2, %v752_v54, 0.0  ;;  %v762_v60 = vld [vmem:[%s656_s19 + $0xa8] sm:$0xff]  ;;  %v243_v62 = vsel %vm203_vm2, %v757_v57, 0.0  ;;  %v767_v63 = vld [vmem:[%s656_s19 + $0xb0] sm:$0xff]  ;;  %v772_v6 = vld [vmem:[%s656_s19 + $0xb8] sm:$0xff] }
  0x16   : > { %v212_v19 = vadd.f32 %v211_v14, %v210_v16  ;;  %v245_v1 = vsel %vm203_vm2, %v762_v60, 0.0  ;;  %v247_v8 = vsel %vm203_vm2, %v767_v63, 0.0  ;;  %v777_v10 = vld [vmem:[%s656_s19 + $0xc0] sm:$0xff]  ;;  %v249_v13 = vsel %vm203_vm2, %v772_v6, 0.0  ;;  %v782_v14 = vld [vmem:[%s656_s19 + $0xc8] sm:$0xff] }
  0x18   : > { %v214_v22 = vadd.f32 %v213_v17, %v212_v19  ;;  %v251_v17 = vsel %vm203_vm2, %v777_v10, 0.0  ;;  %v787_v19 = vld [vmem:[%s656_s19 + $0xd0] sm:$0xff] }
  0x1a   : > { %v216_v25 = vadd.f32 %v215_v20, %v214_v22  ;;  %v253_v22 = vsel %vm203_vm2, %v782_v14, 0.0 }
  0x1c   : > { %v218_v28 = vadd.f32 %v217_v23, %v216_v25  ;;  %v792_v23 = vld [vmem:[%s656_s19 + $0xd8] sm:$0xff] }
  0x1e   : > { %v220_v31 = vadd.f32 %v219_v26, %v218_v28  ;;  %v255_v26 = vsel %vm203_vm2, %v787_v19, 0.0  ;;  %v797_v28 = vld [vmem:[%s656_s19 + $0xe0] sm:$0xff] }
  0x20   : > { %v222_v34 = vadd.f32 %v221_v29, %v220_v31  ;;  %v257_v31 = vsel %vm203_vm2, %v792_v23, 0.0 }
  0x22   : > { %v224_v37 = vadd.f32 %v223_v32, %v222_v34  ;;  %v802_v32 = vld [vmem:[%s656_s19 + $0xe8] sm:$0xff] }
  0x24   : > { %v226_v40 = vadd.f32 %v225_v35, %v224_v37  ;;  %v259_v35 = vsel %vm203_vm2, %v797_v28, 0.0  ;;  %v807_v37 = vld [vmem:[%s656_s19 + $0xf0] sm:$0xff] }
  0x26   : > { %v228_v43 = vadd.f32 %v227_v38, %v226_v40  ;;  %v261_v40 = vsel %vm203_vm2, %v802_v32, 0.0 }
  0x28   : > { %v230_v46 = vadd.f32 %v229_v41, %v228_v43  ;;  %v812_v41 = vld [vmem:[%s656_s19 + $0xf8] sm:$0xff] }
  0x2a   : > { %v232_v49 = vadd.f32 %v231_v44, %v230_v46  ;;  %v263_v44 = vsel %vm203_vm2, %v807_v37, 0.0 }
  0x2c   : > { %v234_v52 = vadd.f32 %v233_v47, %v232_v49  ;;  %v265_v47 = vsel %vm203_vm2, %v812_v41, 0.0 }
  0x2e   : > { %v236_v55 = vadd.f32 %v235_v50, %v234_v52 }
  0x30   : > { %v238_v58 = vadd.f32 %v237_v53, %v236_v55 }
  0x32   : > { %v240_v61 = vadd.f32 %v239_v56, %v238_v58 }
  0x34   : > { %v242_v0 = vadd.f32 %v241_v59, %v240_v61 }
  0x36   : > { %v244_v7 = vadd.f32 %v243_v62, %v242_v0  ;;  %v353_v62 = vld [vmem:[%s930_s2] sm:$0x1] }
  0x37   : > { %589 = vmatpush3.msk.msra.mxu1 %vm358_vm3, %v353_v62 }
  0x38   : > { %v246_v11 = vadd.f32 %v245_v1, %v244_v7 }
  0x3a   : > { %v248_v16 = vadd.f32 %v247_v8, %v246_v11 }
  0x3c   : > { %v250_v20 = vadd.f32 %v249_v13, %v248_v16 }
  0x3e   : > { %v252_v25 = vadd.f32 %v251_v17, %v250_v20  ;;  %v438_v20 = vlaneseq }
  0x40   : > { %v254_v29 = vadd.f32 %v253_v22, %v252_v25  ;;  %v439_v22 = vshrl.u32 %v438_v20, 7 }
  0x42   : > { %v256_v34 = vadd.f32 %v255_v26, %v254_v29  ;;  %v440_v25 = vsub.s32 0, %v439_v22 }
  0x44   : > { %v258_v38 = vadd.f32 %v257_v31, %v256_v34 }
  0x46   : > { %v260_v43 = vadd.f32 %v259_v35, %v258_v38 }
  0x48   : > { %v262_v46 = vadd.f32 %v261_v40, %v260_v43 }
  0x4a   : > { %v264_v49 = vadd.f32 %v263_v44, %v262_v46 }
  0x4c   : > { %v266_v50 = vadd.f32 %v265_v47, %v264_v49 }
  0x4e   : > { %v267_v52 = vrot.slane %v266_v50, 4 }
  0x50   : > { %v268_v53 = vadd.f32 %v267_v52, %v266_v50 }
  0x52   : > { %v269_v55 = vrot.slane %v268_v53, 2 }
  0x54   : > { %v270_v56 = vadd.f32 %v269_v55, %v268_v53 }
  0x56   : > { %v271_v58 = vrot.slane %v270_v56, 1 }
  0x58   : > { %v272_v59 = vadd.f32 %v271_v58, %v270_v56 }
  0x5a   : > { %v273_v61 = vmul.f32 0.00390625, %v272_v59 }
  0x5c   : > { %586 = vmatmul.mubr.msk.f32.vlgmr.msra.gmra.mxu0 %vm203_vm2, %v273_v61 }
 0x11c   : > { %v348_v0 = vpop.f32.mrf.mxu0 }
 0x11d   : > { %v352_v1 = vmax.f32 %v348_v0, 0.0 }
 0x11e   : > { %v587_v7 = vpop.f32.mrf.mxu0 }
 0x11f   : > { %591 = vmatmul.mubr.msk.f32.vlgmr.msra.gmra.mxu1 %vm354_vm4, %v352_v1 }
 0x1df   : > { %v428_v8 = vpop.f32.mrf.mxu1 }
 0x1e0   : > { %v574_v11 = vmul.f32 -1.442695, %v428_v8 }
 0x1e1   : > { %v592_v13 = vpop.f32.mrf.mxu1 }
 0x1e2   : > { %603 = vpow2.f32 %v574_v11 }
 0x1ef   : > { %v604_v16 = vpop.eup %603 }
 0x1f0   : > { %v435_v17 = vadd.f32 1.0, %v604_v16 }
 0x1f2   : > { %605 = vrcp.f32 %v435_v17 }
 0x1ff   : > { %v606_v26 = vpop.eup %605 }
 0x200   : > { %v441_v29 = vrot.slane %v606_v26, %v440_v25 }
 0x202   : > { %v442_v31 = vmul.f32 %v441_v29, %v659_v2  ;;  %v443_v34 = vmul.f32 %v441_v29, %v662_v3  ;;  %v444_v35 = vmul.f32 %v441_v29, %v665_v4  ;;  %v445_v38 = vmul.f32 %v441_v29, %v668_v5 }
 0x203   : > { %v446_v40 = vmul.f32 %v441_v29, %v677_v9  ;;  %v447_v43 = vmul.f32 %v441_v29, %v682_v12  ;;  %v448_v44 = vmul.f32 %v441_v29, %v687_v15  ;;  %v449_v46 = vmul.f32 %v441_v29, %v692_v18 }
 0x204   : > { %v450_v2 = vmul.f32 %v441_v29, %v697_v21  ;;  %v451_v3 = vmul.f32 %v441_v29, %v702_v24  ;;  %v452_v4 = vmul.f32 %v441_v29, %v707_v27  ;;  %v453_v5 = vmul.f32 %v441_v29, %v712_v30  ;;  %474 = vst.msk [vmem:[%s827_s24] sm:$0xff] %vm203_vm2, %v442_v31 }
 0x205   : > { %475 = vst.msk [vmem:[%s827_s24 + $0x8] sm:$0xff] %vm203_vm2, %v443_v34  ;;  %476 = vst.msk [vmem:[%s827_s24 + $0x10] sm:$0xff] %vm203_vm2, %v444_v35  ;;  %v454_v9 = vmul.f32 %v441_v29, %v717_v33  ;;  %v455_v12 = vmul.f32 %v441_v29, %v722_v36  ;;  %v456_v15 = vmul.f32 %v441_v29, %v727_v39 }
 0x206   : > { %477 = vst.msk [vmem:[%s827_s24 + $0x18] sm:$0xff] %vm203_vm2, %v445_v38  ;;  %v457_v18 = vmul.f32 %v441_v29, %v732_v42  ;;  %478 = vst.msk [vmem:[%s827_s24 + $0x20] sm:$0xff] %vm203_vm2, %v446_v40  ;;  %v458_v21 = vmul.f32 %v441_v29, %v737_v45  ;;  %v459_v24 = vmul.f32 %v441_v29, %v742_v48 }
 0x207   : > { %479 = vst.msk [vmem:[%s827_s24 + $0x28] sm:$0xff] %vm203_vm2, %v447_v43  ;;  %480 = vst.msk [vmem:[%s827_s24 + $0x30] sm:$0xff] %vm203_vm2, %v448_v44  ;;  %v460_v27 = vmul.f32 %v441_v29, %v747_v51  ;;  %v461_v30 = vmul.f32 %v441_v29, %v752_v54  ;;  %v462_v33 = vmul.f32 %v441_v29, %v757_v57 }
 0x208   : > { %481 = vst.msk [vmem:[%s827_s24 + $0x38] sm:$0xff] %vm203_vm2, %v449_v46  ;;  %482 = vst.msk [vmem:[%s827_s24 + $0x40] sm:$0xff] %vm203_vm2, %v450_v2  ;;  %v463_v36 = vmul.f32 %v441_v29, %v762_v60  ;;  %v464_v39 = vmul.f32 %v441_v29, %v767_v63  ;;  %v465_v42 = vmul.f32 %v441_v29, %v772_v6 }
 0x209   : > { %483 = vst.msk [vmem:[%s827_s24 + $0x48] sm:$0xff] %vm203_vm2, %v451_v3  ;;  %484 = vst.msk [vmem:[%s827_s24 + $0x50] sm:$0xff] %vm203_vm2, %v452_v4  ;;  %v466_v45 = vmul.f32 %v441_v29, %v777_v10  ;;  %v467_v48 = vmul.f32 %v441_v29, %v782_v14  ;;  %v468_v51 = vmul.f32 %v441_v29, %v787_v19 }
 0x20a   : > { %485 = vst.msk [vmem:[%s827_s24 + $0x58] sm:$0xff] %vm203_vm2, %v453_v5  ;;  %486 = vst.msk [vmem:[%s827_s24 + $0x60] sm:$0xff] %vm203_vm2, %v454_v9  ;;  %v469_v54 = vmul.f32 %v441_v29, %v792_v23  ;;  %v470_v57 = vmul.f32 %v441_v29, %v797_v28  ;;  %v471_v60 = vmul.f32 %v441_v29, %v802_v32 }
 0x20b   : > { %487 = vst.msk [vmem:[%s827_s24 + $0x68] sm:$0xff] %vm203_vm2, %v455_v12  ;;  %488 = vst.msk [vmem:[%s827_s24 + $0x70] sm:$0xff] %vm203_vm2, %v456_v15  ;;  %v472_v63 = vmul.f32 %v441_v29, %v807_v37  ;;  %v473_v6 = vmul.f32 %v441_v29, %v812_v41 }
 0x20c   : > { %489 = vst.msk [vmem:[%s827_s24 + $0x78] sm:$0xff] %vm203_vm2, %v457_v18  ;;  %490 = vst.msk [vmem:[%s827_s24 + $0x80] sm:$0xff] %vm203_vm2, %v458_v21 }
 0x20d   : > { %491 = vst.msk [vmem:[%s827_s24 + $0x88] sm:$0xff] %vm203_vm2, %v459_v24  ;;  %492 = vst.msk [vmem:[%s827_s24 + $0x90] sm:$0xff] %vm203_vm2, %v460_v27 }
 0x20e   : > { %493 = vst.msk [vmem:[%s827_s24 + $0x98] sm:$0xff] %vm203_vm2, %v461_v30  ;;  %494 = vst.msk [vmem:[%s827_s24 + $0xa0] sm:$0xff] %vm203_vm2, %v462_v33 }
 0x20f   : > { %495 = vst.msk [vmem:[%s827_s24 + $0xa8] sm:$0xff] %vm203_vm2, %v463_v36  ;;  %496 = vst.msk [vmem:[%s827_s24 + $0xb0] sm:$0xff] %vm203_vm2, %v464_v39 }
 0x210   : > { %497 = vst.msk [vmem:[%s827_s24 + $0xb8] sm:$0xff] %vm203_vm2, %v465_v42  ;;  %498 = vst.msk [vmem:[%s827_s24 + $0xc0] sm:$0xff] %vm203_vm2, %v466_v45 }
 0x211   : > { %499 = vst.msk [vmem:[%s827_s24 + $0xc8] sm:$0xff] %vm203_vm2, %v467_v48  ;;  %500 = vst.msk [vmem:[%s827_s24 + $0xd0] sm:$0xff] %vm203_vm2, %v468_v51 }
 0x212   : > { %501 = vst.msk [vmem:[%s827_s24 + $0xd8] sm:$0xff] %vm203_vm2, %v469_v54  ;;  %502 = vst.msk [vmem:[%s827_s24 + $0xe0] sm:$0xff] %vm203_vm2, %v470_v57 }
 0x213   : > { %503 = vst.msk [vmem:[%s827_s24 + $0xe8] sm:$0xff] %vm203_vm2, %v471_v60  ;;  %504 = vst.msk [vmem:[%s827_s24 + $0xf0] sm:$0xff] %vm203_vm2, %v472_v63 }
 0x214   : > { %505 = vst.msk [vmem:[%s827_s24 + $0xf8] sm:$0xff] %vm203_vm2, %v473_v6 }
 0x215 PF: > { %s13_s12 = sadd.s32 1, %s613_s12  }
 0x216   : > { %p10_p4 = scmp.ge.s32.totalorder %s13_s12, 4  }
 0x218   :  { %12 = sbr.rel (!%p10_p4) target bundleno = 1 (0x1), region = 62 }

</bundles_post_ra>
